<compile_context>
chip_gen: v7x
topology: tpu7x:2x2x1
jax: 0.10.0
libtpu: 0.0.40
codegen_flags: <defaults>
</compile_context>

<pallas_src>
import functools
import math

import jax
import jax.numpy as jnp
import numpy as np
from jax.experimental import pallas as pl
from jax.experimental.pallas import tpu as pltpu

_LRELU_SLOPE = 0.2
_LRELU_GAIN = math.sqrt(2.0)   # bias_act def_gain for 'lrelu'


def _choose_tile_h(H, W, Cin, Cout, K, use_im2col, budget_bytes=20 << 20):
    """Largest row tile (divisor of H, TILE_H*W multiple of 8) whose double-buffered
    blocks + scratch stay under a conservative VMEM budget on all TPU generations."""
    pad = K // 2
    fixed = 2 * K * K * Cin * Cout * 2                  # (double-buffered) shared bf16 weight
    cands = [t for t in range(H, 0, -1)
             if H % t == 0 and ((t * W) % 8 == 0 or t == H)]
    for t in cands:
        thp, wp = t + 2 * pad, W + 2 * pad
        m = t * W
        need = (fixed
                + 2 * thp * wp * Cin * 2                # double-buffered bf16 input halo tile
                + 2 * m * Cout * 4                      # double-buffered output tile (<= f32)
                + 2 * m * 4)                            # double-buffered noise rows
        if use_im2col:
            need += 2 * m * K * K * Cin * 2             # im2col slab (+ concat headroom)
        else:
            need += m * Cout * 4                        # f32 accumulator scratch
        if need <= budget_bytes:
            return t
    return cands[-1]


def _synthesis_kernel(styles_ref, demod_ref, xt_ref, w_ref, noise_ref, bias_ref,
                      o_ref, *scratch, TILE_H, W, K, Cin, Cout, act_gain,
                      act_clamp, use_im2col):
    M = TILE_H * W

    # ---- modulate the input halo tile by the per-sample style (lane broadcast over Cin) ----
    x = xt_ref[...].astype(jnp.float32)                 # (TILE_H+2p, W+2p, Cin)
    s = styles_ref[...]                                 # (1, Cin) f32
    xmod = (x * s).astype(jnp.bfloat16)

    # ---- KxK conv as MXU matmul(s) over the flattened TILE_H*W rows ----
    if use_im2col:
        # single matmul: (M, K*K*Cin) @ (K*K*Cin, Cout), f32 accumulation
        cols = [xmod[kh:kh + TILE_H, kw:kw + W, :].reshape(M, Cin)
                for kh in range(K) for kw in range(K)]
        col = jnp.concatenate(cols, axis=1)             # (M, K*K*Cin) bf16
        acc = jnp.dot(col, w_ref[...], preferred_element_type=jnp.float32)
    else:
        # large-Cin path: per-tap flattened matmuls into an f32 VMEM scratch accumulator
        acc_ref = scratch[0]
        acc_ref[...] = jnp.zeros_like(acc_ref)
        for kh in range(K):
            for kw in range(K):
                patch = xmod[kh:kh + TILE_H, kw:kw + W, :].reshape(M, Cin)
                acc_ref[...] += jnp.dot(patch, w_ref[kh * K + kw],
                                        preferred_element_type=jnp.float32)
        acc = acc_ref[...]

    # ---- demodulate + noise + bias + leaky-relu * gain (+ optional clamp), all f32 ----
    y = acc * demod_ref[...]                            # (M, Cout) * (1, Cout)
    y = y + noise_ref[...]                              # (M, 1) lane broadcast
    y = y + bias_ref[...]                               # (1, Cout)
    y = jnp.where(y >= 0.0, y, _LRELU_SLOPE * y) * act_gain
    if act_clamp is not None:
        y = jnp.clip(y, -act_clamp, act_clamp)          # act_clamp = conv_clamp * gain
    o_ref[...] = y.astype(o_ref.dtype)


def synthesis_layer_forward(x_nchw, w, params, *, kernel_size=3, gain=1.0,
                            conv_clamp=None, noise_mode="const", noise_key=None,
                            tile_h=None):
    """SynthesisLayer.forward (up=1, residual=False)."""
    B, Cin, H, W = x_nchw.shape
    Cout = params["weight"].shape[0]
    w_dim = w.shape[1]
    K = kernel_size
    pad = K // 2
    act_gain = _LRELU_GAIN * gain
    act_clamp = conv_clamp * gain if conv_clamp is not None else None
    f32 = jnp.float32

    # ---- batched affine (FullyConnectedLayer, bias_init=1) + demod in the wrapper ----
    styles = (w.astype(f32) @ params["affine_weight"].astype(f32).T) / math.sqrt(w_dim) \
        + params["affine_bias"].astype(f32)                   # (B, Cin)
    wt = params["weight"].astype(f32)                          # (Cout, Cin, K, K)
    wsq = jnp.sum(wt * wt, axis=(2, 3))                        # (Cout, Cin)
    demod = jax.lax.rsqrt((styles * styles) @ wsq.T + 1e-8)    # (B, Cout)

    # ---- shared conv weight, laid out for the kernel's matmul (bf16 MXU operands) ----
    w_hwio = jnp.transpose(wt, (2, 3, 1, 0))                   # OIHW -> HWIO (K, K, Cin, Cout)
    use_im2col = (K * K * Cin) <= 1152                         # roughly Cin <= 128 for K=3
    if use_im2col:
        w_mat = w_hwio.reshape(K * K * Cin, Cout).astype(jnp.bfloat16)
        w_spec = pl.BlockSpec((K * K * Cin, Cout), lambda b, t: (0, 0))
    else:
        w_mat = w_hwio.reshape(K * K, Cin, Cout).astype(jnp.bfloat16)
        w_spec = pl.BlockSpec((K * K, Cin, Cout), lambda b, t: (0, 0, 0))

    # ---- spatial row tiling with a `pad`-row halo on each side ----
    TILE_H = tile_h if tile_h is not None else _choose_tile_h(H, W, Cin, Cout, K, use_im2col)
    assert H % TILE_H == 0, (H, TILE_H)
    nT = H // TILE_H
    THp, Wp = TILE_H + 2 * pad, W + 2 * pad
    M = TILE_H * W

    x_nhwc = jnp.transpose(x_nchw, (0, 2, 3, 1)).astype(jnp.bfloat16)
    xp = jnp.pad(x_nhwc, ((0, 0), (pad, pad), (pad, pad), (0, 0)))
    if nT == 1:
        x_tiles = xp[:, None]                                   # (B, 1, Hp, Wp, Cin)
    else:
        x_tiles = jnp.stack(
            [xp[:, t * TILE_H: t * TILE_H + THp] for t in range(nT)], axis=1)

    # ---- noise (added after the conv, before bias/act), flattened for lane broadcast ----
    if noise_mode == "const":
        noise = (params["noise_const"].astype(f32)
                 * params["noise_strength"]).reshape(1, H * W, 1)
    elif noise_mode == "random":
        assert noise_key is not None, "noise_mode='random' needs noise_key"
        noise = jax.random.normal(noise_key, (B, H * W, 1), f32) * params["noise_strength"]
    else:  # 'none'
        noise = jnp.zeros((1, H * W, 1), f32)
    per_sample_noise = noise.shape[0] != 1
    noise_spec = pl.BlockSpec(
        (None, M, 1),
        (lambda b, t: (b, t, 0)) if per_sample_noise else (lambda b, t: (0, t, 0)))

    bias = params["bias"].astype(f32).reshape(1, Cout)

    kern = functools.partial(
        _synthesis_kernel, TILE_H=TILE_H, W=W, K=K, Cin=Cin, Cout=Cout,
        act_gain=act_gain, act_clamp=act_clamp, use_im2col=use_im2col)

    out_flat = pl.pallas_call(
        kern,
        out_shape=jax.ShapeDtypeStruct((B, H * W, Cout), x_nchw.dtype),
        grid=(B, nT),
        in_specs=[
            pl.BlockSpec((None, 1, Cin), lambda b, t: (b, 0, 0)),                   # styles
            pl.BlockSpec((None, 1, Cout), lambda b, t: (b, 0, 0)),                  # demod
            pl.BlockSpec((None, None, THp, Wp, Cin), lambda b, t: (b, t, 0, 0, 0)),  # x halo tile
            w_spec,                                                                 # shared weight
            noise_spec,                                                             # scaled noise rows
            pl.BlockSpec((1, Cout), lambda b, t: (0, 0)),                           # bias
        ],
        out_specs=pl.BlockSpec((None, M, Cout), lambda b, t: (b, t, 0)),
        scratch_shapes=(() if use_im2col
                        else (pltpu.VMEM((M, Cout), jnp.float32),)),
        compiler_params=pltpu.CompilerParams(
            dimension_semantics=("parallel", "parallel"),
            vmem_limit_bytes=48 * 1024 * 1024),
    )(styles.reshape(B, 1, Cin), demod.reshape(B, 1, Cout),
      x_tiles, w_mat, noise, bias)

    out_nhwc = out_flat.reshape(B, H, W, Cout)
    return jnp.transpose(out_nhwc, (0, 3, 1, 2))                # back to NCHW


def _ref_forward(x, w, params, gain=1.0):
    """Pure-JAX reference of the same forward (NCHW, f32, noise_mode='const')."""
    B, Cin, H, W = x.shape
    w_dim = w.shape[1]
    styles = (w @ params["affine_weight"].T) / math.sqrt(w_dim) + params["affine_bias"]
    wt = params["weight"]                                        # (O, I, k, k)
    wmod = wt[None] * styles[:, None, :, None, None]             # (B, O, I, k, k)
    demod = jax.lax.rsqrt(jnp.sum(wmod ** 2, axis=(2, 3, 4)) + 1e-8)
    wmod = wmod * demod[:, :, None, None, None]
    ys = []
    for b in range(B):
        ys.append(jax.lax.conv_general_dilated(
            x[b:b + 1], wmod[b], window_strides=(1, 1), padding="SAME",
            dimension_numbers=("NCHW", "OIHW", "NCHW")))
    y = jnp.concatenate(ys, axis=0)
    y = y + (params["noise_const"] * params["noise_strength"])[None, None]
    y = y + params["bias"][None, :, None, None]
    y = jnp.where(y >= 0, y, _LRELU_SLOPE * y) * (_LRELU_GAIN * gain)
    return y


if __name__ == "__main__":
    B, Cin, Cout, w_dim, res, K = 2, 4, 8, 32, 16, 3

    key = jax.random.PRNGKey(0)
    ks = jax.random.split(key, 6)
    params = dict(
        weight=jax.random.normal(ks[0], (Cout, Cin, K, K), jnp.float32),   # randn per __init__
        bias=0.1 * jax.random.normal(ks[5], (Cout,), jnp.float32),         # nonzero to exercise bias path
        affine_weight=jax.random.normal(ks[1], (Cin, w_dim), jnp.float32),
        affine_bias=jnp.ones((Cin,), jnp.float32),                         # bias_init=1
        noise_const=jax.random.normal(ks[2], (res, res), jnp.float32),
        noise_strength=jnp.float32(0.1),                                   # nonzero to exercise noise path
    )

    x = jax.random.normal(ks[3], (B, Cin, res, res), jnp.float32)
    w = jax.random.normal(ks[4], (B, w_dim), jnp.float32)

    y_ref = _ref_forward(x, w, params)

    # exercise both the halo-row-tile path (tile_h=8 -> 2 tiles) and the auto (single-tile) path
    for th in (8, None):
        y = jax.block_until_ready(
            synthesis_layer_forward(x, w, params, noise_mode="const", tile_h=th))
        assert y.shape == (B, Cout, res, res), y.shape
        np.testing.assert_allclose(np.asarray(y), np.asarray(y_ref), rtol=5e-2, atol=5e-2)

    print("KERNEL_OK")
</pallas_src>

<mosaic_0001>
module attributes {stable_mosaic.version = 11 : i64} {
  func.func @_synthesis_kernel(%arg0: i32, %arg1: i32, %arg2: memref<1x1x4xf32, #tpu.memory_space<vmem>>, %arg3: memref<1x1x8xf32, #tpu.memory_space<vmem>>, %arg4: memref<1x1x10x18x4xbf16, #tpu.memory_space<vmem>>, %arg5: memref<36x8xbf16, #tpu.memory_space<vmem>>, %arg6: memref<1x128x1xf32, #tpu.memory_space<vmem>>, %arg7: memref<1x8xf32, #tpu.memory_space<vmem>>, %arg8: memref<1x128x8xf32, #tpu.memory_space<vmem>>) attributes {dimension_semantics = [#tpu.dimension_semantics<parallel>, #tpu.dimension_semantics<parallel>], iteration_bounds = array<i64: 2, 2>, scalar_prefetch = 0 : i64, scratch_operands = 0 : i64, tpu.core_type = #tpu.core_type<tc>, window_params = [{transform_indices = @transform_0, window_bounds = array<i64: 1, 1, 4>}, {transform_indices = @transform_1, window_bounds = array<i64: 1, 1, 8>}, {transform_indices = @transform_2, window_bounds = array<i64: 1, 1, 10, 18, 4>}, {pipeline_mode = #tpu.pipeline_mode<synchronous>, transform_indices = @transform_3, window_bounds = array<i64: 36, 8>}, {transform_indices = @transform_4, window_bounds = array<i64: 1, 128, 1>}, {pipeline_mode = #tpu.pipeline_mode<synchronous>, transform_indices = @transform_5, window_bounds = array<i64: 1, 8>}, {transform_indices = @transform_6, window_bounds = array<i64: 1, 128, 8>}]} {
    %c0 = arith.constant 0 : index
    %c0_0 = arith.constant 0 : index
    %c0_1 = arith.constant 0 : index
    %c0_2 = arith.constant 0 : index
    %c0_3 = arith.constant 0 : index
    %0 = vector.load %arg4[%c0, %c0_0, %c0_1, %c0_2, %c0_3] : memref<1x1x10x18x4xbf16, #tpu.memory_space<vmem>>, vector<1x1x10x18x4xbf16>
    %1 = vector.shape_cast %0 : vector<1x1x10x18x4xbf16> to vector<10x18x4xbf16>
    %2 = arith.extf %1 : vector<10x18x4xbf16> to vector<10x18x4xf32>
    %c0_4 = arith.constant 0 : index
    %c0_5 = arith.constant 0 : index
    %c0_6 = arith.constant 0 : index
    %3 = vector.load %arg2[%c0_4, %c0_5, %c0_6] : memref<1x1x4xf32, #tpu.memory_space<vmem>>, vector<1x1x4xf32>
    %4 = vector.shape_cast %3 : vector<1x1x4xf32> to vector<1x4xf32>
    %5 = vector.shape_cast %4 : vector<1x4xf32> to vector<1x1x4xf32>
    %6 = vector.broadcast %5 : vector<1x1x4xf32> to vector<10x18x4xf32>
    %7 = arith.mulf %2, %6 : vector<10x18x4xf32>
    %8 = arith.truncf %7 : vector<10x18x4xf32> to vector<10x18x4xbf16>
    %9 = vector.extract_strided_slice %8 {offsets = [0, 0, 0], sizes = [8, 16, 4], strides = [1, 1, 1]} : vector<10x18x4xbf16> to vector<8x16x4xbf16>
    %10 = vector.shape_cast %9 : vector<8x16x4xbf16> to vector<128x4xbf16>
    %11 = vector.extract_strided_slice %8 {offsets = [0, 1, 0], sizes = [8, 16, 4], strides = [1, 1, 1]} : vector<10x18x4xbf16> to vector<8x16x4xbf16>
    %12 = vector.shape_cast %11 : vector<8x16x4xbf16> to vector<128x4xbf16>
    %13 = vector.extract_strided_slice %8 {offsets = [0, 2, 0], sizes = [8, 16, 4], strides = [1, 1, 1]} : vector<10x18x4xbf16> to vector<8x16x4xbf16>
    %14 = vector.shape_cast %13 : vector<8x16x4xbf16> to vector<128x4xbf16>
    %15 = vector.extract_strided_slice %8 {offsets = [1, 0, 0], sizes = [8, 16, 4], strides = [1, 1, 1]} : vector<10x18x4xbf16> to vector<8x16x4xbf16>
    %16 = vector.shape_cast %15 : vector<8x16x4xbf16> to vector<128x4xbf16>
    %17 = vector.extract_strided_slice %8 {offsets = [1, 1, 0], sizes = [8, 16, 4], strides = [1, 1, 1]} : vector<10x18x4xbf16> to vector<8x16x4xbf16>
    %18 = vector.shape_cast %17 : vector<8x16x4xbf16> to vector<128x4xbf16>
    %19 = vector.extract_strided_slice %8 {offsets = [1, 2, 0], sizes = [8, 16, 4], strides = [1, 1, 1]} : vector<10x18x4xbf16> to vector<8x16x4xbf16>
    %20 = vector.shape_cast %19 : vector<8x16x4xbf16> to vector<128x4xbf16>
    %21 = vector.extract_strided_slice %8 {offsets = [2, 0, 0], sizes = [8, 16, 4], strides = [1, 1, 1]} : vector<10x18x4xbf16> to vector<8x16x4xbf16>
    %22 = vector.shape_cast %21 : vector<8x16x4xbf16> to vector<128x4xbf16>
    %23 = vector.extract_strided_slice %8 {offsets = [2, 1, 0], sizes = [8, 16, 4], strides = [1, 1, 1]} : vector<10x18x4xbf16> to vector<8x16x4xbf16>
    %24 = vector.shape_cast %23 : vector<8x16x4xbf16> to vector<128x4xbf16>
    %25 = vector.extract_strided_slice %8 {offsets = [2, 2, 0], sizes = [8, 16, 4], strides = [1, 1, 1]} : vector<10x18x4xbf16> to vector<8x16x4xbf16>
    %26 = vector.shape_cast %25 : vector<8x16x4xbf16> to vector<128x4xbf16>
    %27 = tpu.concatenate %10, %12, %14, %16, %18, %20, %22, %24, %26 in 1 : vector<128x4xbf16>, vector<128x4xbf16>, vector<128x4xbf16>, vector<128x4xbf16>, vector<128x4xbf16>, vector<128x4xbf16>, vector<128x4xbf16>, vector<128x4xbf16>, vector<128x4xbf16> -> vector<128x36xbf16>
    %c0_7 = arith.constant 0 : index
    %c0_8 = arith.constant 0 : index
    %28 = vector.load %arg5[%c0_7, %c0_8] : memref<36x8xbf16, #tpu.memory_space<vmem>>, vector<36x8xbf16>
    %cst = arith.constant dense<0.000000e+00> : vector<128x8xf32>
    %29 = tpu.matmul %27, %28, %cst {dimension_numbers = #tpu.dot_dimension_numbers<[1], [0], [0], [1], [0, 0, 1, 1], [], []>} : vector<128x36xbf16>, vector<36x8xbf16>, vector<128x8xf32> -> vector<128x8xf32>
    %c0_9 = arith.constant 0 : index
    %c0_10 = arith.constant 0 : index
    %c0_11 = arith.constant 0 : index
    %30 = vector.load %arg3[%c0_9, %c0_10, %c0_11] : memref<1x1x8xf32, #tpu.memory_space<vmem>>, vector<1x1x8xf32>
    %31 = vector.shape_cast %30 : vector<1x1x8xf32> to vector<1x8xf32>
    %32 = vector.broadcast %31 : vector<1x8xf32> to vector<128x8xf32>
    %33 = arith.mulf %29, %32 : vector<128x8xf32>
    %c0_12 = arith.constant 0 : index
    %c0_13 = arith.constant 0 : index
    %c0_14 = arith.constant 0 : index
    %34 = vector.load %arg6[%c0_12, %c0_13, %c0_14] : memref<1x128x1xf32, #tpu.memory_space<vmem>>, vector<1x128x1xf32>
    %35 = vector.shape_cast %34 : vector<1x128x1xf32> to vector<128x1xf32>
    %36 = vector.broadcast %35 : vector<128x1xf32> to vector<128x8xf32>
    %37 = arith.addf %33, %36 : vector<128x8xf32>
    %c0_15 = arith.constant 0 : index
    %c0_16 = arith.constant 0 : index
    %38 = vector.load %arg7[%c0_15, %c0_16] : memref<1x8xf32, #tpu.memory_space<vmem>>, vector<1x8xf32>
    %39 = vector.broadcast %38 : vector<1x8xf32> to vector<128x8xf32>
    %40 = arith.addf %37, %39 : vector<128x8xf32>
    %cst_17 = arith.constant 0.000000e+00 : f32
    %41 = vector.broadcast %cst_17 : f32 to vector<128x8xf32>
    %42 = arith.cmpf oge, %40, %41 : vector<128x8xf32>
    %cst_18 = arith.constant 2.000000e-01 : f32
    %43 = vector.broadcast %cst_18 : f32 to vector<128x8xf32>
    %44 = arith.mulf %43, %40 : vector<128x8xf32>
    %45 = arith.select %42, %40, %44 : vector<128x8xi1>, vector<128x8xf32>
    %cst_19 = arith.constant 1.41421354 : f32
    %46 = vector.broadcast %cst_19 : f32 to vector<128x8xf32>
    %47 = arith.mulf %45, %46 : vector<128x8xf32>
    %c0_20 = arith.constant 0 : index
    %c0_21 = arith.constant 0 : index
    %c0_22 = arith.constant 0 : index
    %48 = vector.load %arg8[%c0_20, %c0_21, %c0_22] : memref<1x128x8xf32, #tpu.memory_space<vmem>>, vector<1x128x8xf32>
    %49 = vector.shape_cast %48 : vector<1x128x8xf32> to vector<128x8xf32>
    %50 = vector.shape_cast %47 : vector<128x8xf32> to vector<1x128x8xf32>
    tpu.vector_store %arg8[%c0_20, %c0_21, %c0_22], %50 {strides = array<i32>} : memref<1x128x8xf32, #tpu.memory_space<vmem>>, vector<1x128x8xf32>,
    return
  }
  func.func @transform_0(%arg0: i32, %arg1: i32) -> (i32, i32, i32) {
    %c0_i32 = arith.constant 0 : i32
    %c0_i32_0 = arith.constant 0 : i32
    %c0_i32_1 = arith.constant 0 : i32
    return %arg0, %c0_i32, %c0_i32_0 : i32, i32, i32
  }
  func.func @transform_1(%arg0: i32, %arg1: i32) -> (i32, i32, i32) {
    %c0_i32 = arith.constant 0 : i32
    %c0_i32_0 = arith.constant 0 : i32
    %c0_i32_1 = arith.constant 0 : i32
    return %arg0, %c0_i32, %c0_i32_0 : i32, i32, i32
  }
  func.func @transform_2(%arg0: i32, %arg1: i32) -> (i32, i32, i32, i32, i32) {
    %c0_i32 = arith.constant 0 : i32
    %c0_i32_0 = arith.constant 0 : i32
    %c0_i32_1 = arith.constant 0 : i32
    %c0_i32_2 = arith.constant 0 : i32
    return %arg0, %arg1, %c0_i32, %c0_i32_0, %c0_i32_1 : i32, i32, i32, i32, i32
  }
  func.func @transform_3(%arg0: i32, %arg1: i32) -> (i32, i32) {
    %c0_i32 = arith.constant 0 : i32
    %c0_i32_0 = arith.constant 0 : i32
    %c0_i32_1 = arith.constant 0 : i32
    return %c0_i32, %c0_i32_0 : i32, i32
  }
  func.func @transform_4(%arg0: i32, %arg1: i32) -> (i32, i32, i32) {
    %c0_i32 = arith.constant 0 : i32
    %c0_i32_0 = arith.constant 0 : i32
    %c0_i32_1 = arith.constant 0 : i32
    return %c0_i32, %arg1, %c0_i32_0 : i32, i32, i32
  }
  func.func @transform_5(%arg0: i32, %arg1: i32) -> (i32, i32) {
    %c0_i32 = arith.constant 0 : i32
    %c0_i32_0 = arith.constant 0 : i32
    %c0_i32_1 = arith.constant 0 : i32
    return %c0_i32, %c0_i32_0 : i32, i32
  }
  func.func @transform_6(%arg0: i32, %arg1: i32) -> (i32, i32, i32) {
    %c0_i32 = arith.constant 0 : i32
    %c0_i32_0 = arith.constant 0 : i32
    return %arg0, %arg1, %c0_i32 : i32, i32, i32
  }
}

</mosaic_0001>

<bundles_post_ra>
// kernel: tpu_custom_call.1
= control target key start
LH: loop header
LB: loop body
LE: loop exit
PB: predicated region body
PF: predicated region fallthrough
CT: control target
= control target key end

     0   :  { %s1624_s21 = smov 0   ;;  %s1626_s22 = smov 0   ;;  %s2191_s0 = inlined_call_operand.vmem [shape: f32[2,1,4], index: 0, kind: input, shape index: {}]   ;;  %s2192_s1 = inlined_call_operand.vmem [shape: f32[2,1,8], index: 1, kind: input, shape index: {}]   ;;  %s2193_s2 = inlined_call_operand.vmem [shape: bf16[2,2,10,18,4], index: 2, kind: input, shape index: {}]   ;;  %s2194_s3 = inlined_call_operand.vmem [shape: bf16[36,8], index: 3, kind: input, shape index: {}]   ;;  %s2195_s4 = inlined_call_operand.vmem [shape: f32[1,256,1], index: 4, kind: input, shape index: {}]   ;;  %s2196_s5 = inlined_call_operand.vmem [shape: f32[1,8], index: 5, kind: input, shape index: {}]   ;;  %s2197_s6 = inlined_call_operand.vmem [shape: f32[2,256,8], index: 6, kind: output, shape index: {}]  }
   0x1   :  { %s1628_s23 = smov 0   ;;  %s1630_s24 = smov 0  }
   0x2   :  { %s1632_s25 = smov 0  }
   0x3 LB: > { %s25_s26 = sadd.s32 1, %s1570_s23  ;;  %s28_s27 = sadd.s32 1, %s1574_s24  ;;  %s1578_s25 = sphi %s1632_s25, %s16_s25   ;;  %s1574_s24 = sphi %s1630_s24, %s2201_s24   ;;  %s1570_s23 = sphi %s1628_s23, %s2200_s23   ;;  %s1566_s22 = sphi %s1626_s22, %s2199_s22   ;;  %s1562_s21 = sphi %s1624_s21, %s2198_s21  }
   0x4   : > { %p26_p0 = scmp.ge.s32.totalorder %s25_s26, 2  ;;  %p1396_p1 = scmp.ge.s32.totalorder %s1578_s25, 1 }
   0x5   : > { %p259_p2 = scmp.lt.s32.totalorder %s1578_s25, 5 }
   0x6   : > { %s2203_s26 = smov (%p26_p0, %s25_s26), 0  ;;  %s2205_s27 = smov (!%p26_p0, %s28_s27), %s1574_s24 }
   0x7   : > { %p260_p3 = pnand %p1396_p1, %p259_p2  ;;  %p30_p4 = scmp.ge.s32.totalorder %s2205_s27, 2 }
   0x8   : > { %p308_p5 = scmp.lt.s32.totalorder (!%p260_p3), %s1566_s22, 1  ;;  %p316_p6 = scmp.lt.s32.totalorder (!%p260_p3), %s1562_s21, 1  ;;  %vm570_vm0 = vcmask (!%p260_p3), 1046528   ;;  %vm457_vm1 = vsmask.f32 (!%p260_p3), 7424  ;;  %vm930_vm2 = vcmask (!%p260_p3), 1041408  }
   0x9   : > { %s2207_s27 = smov (%p30_p4, %s2205_s27), 0  ;;  %263 = sbr.rel (%p260_p3) target bundleno = 504 (0x1f8), region = 44 }
   0xa   : > { %s1580_s15 = smov (!%p260_p3), 12   ;;  %s1581_s16 = smov (!%p260_p3), 8   ;;  %vm757_vm3 = vcmask (!%p260_p3), 31744   ;;  %vm774_vm4 = vcmask (!%p260_p3), 64512   ;;  %vm791_vm5 = vcmask (!%p260_p3), 97280   ;;  %vm808_vm6 = vcmask (!%p260_p3), 130048  }
   0xb   : > { %s1582_s17 = smov (!%p260_p3), 4   ;;  %s1583_s18 = smov (!%p260_p3), 16   ;;  %vm825_vm7 = vcmask (!%p260_p3), 162816   ;;  %vm842_vm8 = vcmask (!%p260_p3), 195584   ;;  %vm859_vm9 = vcmask (!%p260_p3), 228352   ;;  %vm876_vm10 = vcmask (!%p260_p3), 261120  }
   0xc   : > { %s1584_s19 = smov (!%p260_p3), 20   ;;  %s1398_s12 = sshll.u32 (!%p260_p3), %s1562_s21, 4  ;;  %vm913_vm11 = vcmask (!%p260_p3), 293888  }
   0xd   : > { %p324_p7 = scmp.lt.s32.totalorder (!%p260_p3), %s1398_s12, 31 }
  0x10   : > { %s2209_s22 = smov (!%p308_p5, %s1566_s22), 1  ;;  %s2211_s12 = smov (!%p324_p7, %s1398_s12), 31 }
  0x11   : > { %s317_s28 = scalar_select %p316_p6, %s1562_s21, 1 }
  0x12   : > { %s1485_s29 = smul.u32 60, %s2209_s22  ;;  %s310_s9 = scalar_lea.vmem %s2191_s0, %s2209_s22 }
  0x13   : > { %s1484_s30 = smul.u32 30, %s317_s28  ;;  %v1670_v0 = vld [vmem:[%s310_s9] ss:$0 sm:$0xff]  ;;  %s1399_s21 = sshll.u32 %s2211_s12, 3 }
  0x15   : > { %s320_s10 = sadd.s32 %s1485_s29, %s1484_s30  ;;  %s1585_s29 = smov 24  }
  0x16   : > { %s1397_s11 = sshll.u32 %s320_s10, 2  ;;  %s1586_s10 = smov 28  }
  0x17   : > { %s1668_s14 = scalar_lea.vmem %s2193_s2, %s1397_s11  ;;  %s1587_s11 = smov 32  }
  0x18   : > { %v355_v1 = vld [vmem:[%s1668_s14 + $0x3c] sm:$0xff]   ;;  %v343_v2 = vld [vmem:[%s1668_s14 + $0xc] sm:$0xff]   ;;  %v354_v18 = vld [vmem:[%s1668_s14 + $0x38] sm:$0x1] }
  0x19   : > { %v1441_v3 = vld [vmem:[%s1668_s14 + $0x48] sm:$0xff]   ;;  %v385_v4 = vunpack.c.l.bf16 %v355_v1  ;;  %v386_v5 = vunpack.c.h.bf16 %v355_v1  ;;  %v373_v6 = vunpack.c.l.bf16 %v343_v2  ;;  %v374_v7 = vunpack.c.h.bf16 %v343_v2  ;;  %v1439_v8 = vld [vmem:[%s1668_s14 + $0x18] sm:$0xff]   ;;  %v1440_v13 = vld [vmem:[%s1668_s14 + $0x30] sm:$0xff]  }
  0x1a   : > { %v1433_v9 = vunpack.c.l.bf16 %v1441_v3  ;;  %v1434_v10 = vunpack.c.h.bf16 %v1441_v3  ;;  %v1425_v11 = vunpack.c.l.bf16 %v1439_v8  ;;  %v1426_v12 = vunpack.c.h.bf16 %v1439_v8  ;;  %v1420_v19 = vld [vmem:[%s1668_s14] sm:$0xff]   ;;  %v342_v24 = vld [vmem:[%s1668_s14 + $0x8] sm:$0x1]  ;;  %v345_v34 = vld [vmem:[%s1668_s14 + $0x14] sm:$0x1] }
  0x1b   : > { %v422_v14 = vmul.f32 %v1670_v0, %v385_v4  ;;  %v423_v15 = vmul.f32 %v1670_v0, %v386_v5  ;;  %v410_v16 = vmul.f32 %v1670_v0, %v373_v6  ;;  %v411_v17 = vmul.f32 %v1670_v0, %v374_v7  ;;  %v357_v29 = vld [vmem:[%s1668_s14 + $0x44] sm:$0x1] }
  0x1c   : > { %v425_v20 = vmul.f32 %v1433_v9, %v1670_v0  ;;  %v426_v21 = vmul.f32 %v1434_v10, %v1670_v0  ;;  %v413_v22 = vmul.f32 %v1425_v11, %v1670_v0  ;;  %v414_v23 = vmul.f32 %v1426_v12, %v1670_v0  ;;  %v360_v12 = vld [vmem:[%s1668_s14 + $0x50] sm:$0x1] }
  0x1d   : > { %v1688_v25 = vpack.c.bf16 %v423_v15, %v422_v14  ;;  %v1690_v26 = vpack.c.bf16 %v411_v17, %v410_v16  ;;  %v1429_v27 = vunpack.c.l.bf16 %v1440_v13  ;;  %v1430_v28 = vunpack.c.h.bf16 %v1440_v13 }
  0x1e   : > { %v1693_v30 = vpack.c.bf16 %v426_v21, %v425_v20  ;;  %v1695_v31 = vpack.c.bf16 %v414_v23, %v413_v22  ;;  %v384_v32 = vunpack.c.l.bf16 %v354_v18  ;;  %v1421_v33 = vunpack.c.l.bf16 %v1420_v19  ;;  %v348_v21 = vld [vmem:[%s1668_s14 + $0x20] sm:$0x1] }
  0x1f   : > { %669 = vrot.lane.b32.xlu1 %v1688_v25, %s1580_s15  ;;  %661 = vrot.lane.b32.xlu0 %v1690_v26, %s1580_s15  ;;  %v419_v35 = vmul.f32 %v1429_v27, %v1670_v0  ;;  %v420_v36 = vmul.f32 %v1430_v28, %v1670_v0  ;;  %v1422_v37 = vunpack.c.h.bf16 %v1420_v19  ;;  %v372_v38 = vunpack.c.l.bf16 %v342_v24 }
  0x20   : > { %v421_v39 = vmul.f32 %v1670_v0, %v384_v32  ;;  %v407_v40 = vmul.f32 %v1421_v33, %v1670_v0  ;;  %v387_v41 = vunpack.c.l.bf16 %v357_v29  ;;  %v586_v42 = vrot.slane %v1688_v25, 1 }
  0x21   : > { %v1707_v43 = vpack.c.bf16 %v420_v36, %v419_v35  ;;  %v408_v44 = vmul.f32 %v1422_v37, %v1670_v0  ;;  %v409_v45 = vmul.f32 %v1670_v0, %v372_v38  ;;  %v375_v46 = vunpack.c.l.bf16 %v345_v34 }
  0x22   : > { %v446_v47 = vpack.c.bf16 %v421_v39, %v421_v39  ;;  %v424_v48 = vmul.f32 %v1670_v0, %v387_v41  ;;  %v574_v49 = vrot.slane %v1690_v26, 1  ;;  %v471_v50 = vshrl.u32 %v1690_v26, 16 }
  0x23   : > { %671 = vrot.lane.b32.xlu1 %v1693_v30, %s1580_s15  ;;  %663 = vrot.lane.b32.xlu0 %v1695_v31, %s1580_s15  ;;  %v583_v51 = vrot.slane %v1707_v43, 1  ;;  %v1719_v52 = vpack.c.bf16 %v408_v44, %v407_v40  ;;  %v438_v53 = vpack.c.bf16 %v409_v45, %v409_v45  ;;  %v412_v54 = vmul.f32 %v1670_v0, %v375_v46 }
  0x24   : > { %v584_v55 = vrot.slane %v446_v47, 1  ;;  %v448_v56 = vpack.c.bf16 %v424_v48, %v424_v48  ;;  %v473_v57 = vshll.u32 %v1690_v26, 16  ;;  %v519_v58 = vshrl.u32 %v1688_v25, 16 }
  0x25   : > { %v571_v59 = vrot.slane %v1719_v52, 1  ;;  %v572_v60 = vrot.slane %v438_v53, 1  ;;  %v440_v61 = vpack.c.bf16 %v412_v54, %v412_v54  ;;  %v459_v62 = vshrl.u32 %v1719_v52, 16 }
  0x26   : > { %v1727_v63 = vsel %vm570_vm0, %v583_v51, %v584_v55  ;;  %v587_v1 = vrot.slane %v448_v56, 1  ;;  %v475_v2 = vrot.slane %v473_v57, 1  ;;  %v461_v3 = vshll.u32 %v1719_v52, 16  ;;  %v361_v51 = vld [vmem:[%s1668_s14 + $0x54] sm:$0xff]  }
  0x27   : > { %653 = vrot.lane.b32.xlu1 %v1727_v63, %s1581_s16  ;;  %v573_v4 = vsel %vm570_vm0, %v571_v59, %v572_v60  ;;  %v575_v5 = vrot.slane %v440_v61, 1  ;;  %v478_v6 = vshll.u32 %v440_v61, 16  ;;  %v466_v7 = vshll.u32 %v438_v53, 16  ;;  %v1442_v53 = vld [vmem:[%s1668_s14 + $0x60] sm:$0xff]  }
  0x28   : > { %645 = vrot.lane.b32.xlu0 %v573_v4, %s1581_s16  ;;  %v1735_v8 = vsel %vm570_vm0, %v586_v42, %v587_v1  ;;  %v476_v9 = vor.u32 %v475_v2, %v471_v50  ;;  %v463_v10 = vrot.slane %v461_v3, 1  ;;  %v521_v11 = vshll.u32 %v1688_v25, 16  ;;  %v363_v4 = vld [vmem:[%s1668_s14 + $0x5c] sm:$0x1] }
  0x29   : > { %v1740_v13 = vsel %vm570_vm0, %v574_v49, %v575_v5  ;;  %v480_v14 = vrot.slane %v478_v6, 1  ;;  %v468_v15 = vrot.slane %v466_v7, 1  ;;  %v526_v16 = vshll.u32 %v448_v56, 16 }
  0x2a   : > { %v464_v17 = vor.u32 %v463_v10, %v459_v62  ;;  %v523_v18 = vrot.slane %v521_v11, 1  ;;  %v507_v19 = vshrl.u32 %v1707_v43, 16  ;;  %v509_v20 = vshll.u32 %v1707_v43, 16  ;;  %v366_v62 = vld [vmem:[%s1668_s14 + $0x68] sm:$0x1] }
  0x2b   : > { %655 = vrot.lane.b32.xlu1 %v1735_v8, %s1581_s16  ;;  %v481_v22 = vsel %vm457_vm1, %v476_v9, %v480_v14  ;;  %v514_v23 = vshll.u32 %v446_v47, 16  ;;  %v390_v24 = vunpack.c.l.bf16 %v360_v12  ;;  %v528_v29 = vrot.slane %v526_v16, 1  ;;  %v351_v12 = vld [vmem:[%s1668_s14 + $0x2c] sm:$0x1] }
  0x2c   : > { %647 = vrot.lane.b32.xlu0 %v1740_v13, %s1581_s16  ;;  %v469_v27 = vsel %vm457_vm1, %v464_v17, %v468_v15  ;;  %v524_v28 = vor.u32 %v523_v18, %v519_v58  ;;  %v511_v32 = vrot.slane %v509_v20, 1  ;;  %v533_v35 = vshll.u32 %v1693_v30, 16  ;;  %v349_v58 = vld [vmem:[%s1668_s14 + $0x24] sm:$0xff]  }
  0x2d   : > { %v516_v33 = vrot.slane %v514_v23, 1  ;;  %v427_v34 = vmul.f32 %v1670_v0, %v390_v24  ;;  %v378_v36 = vunpack.c.l.bf16 %v348_v21  ;;  %v485_v38 = vshll.u32 %v1695_v31, 16  ;;  %v367_v24 = vld [vmem:[%s1668_s14 + $0x6c] sm:$0xff]  }
  0x2e   : > { %v512_v37 = vor.u32 %v511_v32, %v507_v19  ;;  %v1758_v41 = vsel %vm457_vm1, %v524_v28, %v528_v29  ;;  %v531_v42 = vshrl.u32 %v1693_v30, 16  ;;  %v535_v44 = vrot.slane %v533_v35, 1  ;;  %v369_v32 = vld [vmem:[%s1668_s14 + $0x74] sm:$0x1] }
  0x2f   : > { %631 = vrot.lane.b32.xlu1 %v481_v22, %s1582_s17  ;;  %v450_v39 = vpack.c.bf16 %v427_v34, %v427_v34  ;;  %v415_v40 = vmul.f32 %v1670_v0, %v378_v36  ;;  %v483_v45 = vshrl.u32 %v1695_v31, 16  ;;  %v487_v49 = vrot.slane %v485_v38, 1 }
  0x30   : > { %629 = vrot.lane.b32.xlu0 %v469_v27, %s1582_s17  ;;  %v1763_v46 = vsel %vm457_vm1, %v512_v37, %v516_v33  ;;  %v536_v54 = vor.u32 %v535_v44, %v531_v42  ;;  %v391_v59 = vunpack.c.l.bf16 %v361_v51  ;;  %v392_v60 = vunpack.c.h.bf16 %v361_v51 }
  0x31   : > { %v538_v47 = vshll.u32 %v450_v39, 16  ;;  %v442_v48 = vpack.c.bf16 %v415_v40, %v415_v40  ;;  %v488_v56 = vor.u32 %v487_v49, %v483_v45  ;;  %v1437_v61 = vunpack.c.l.bf16 %v1442_v53 }
  0x32   : > { %v589_v1 = vrot.slane %v1693_v30, 1  ;;  %v590_v2 = vrot.slane %v450_v39, 1  ;;  %v577_v3 = vrot.slane %v1695_v31, 1  ;;  %v1438_v5 = vunpack.c.h.bf16 %v1442_v53 }
  0x33   : > { %639 = vrot.lane.b32.xlu1 %v1758_v41, %s1582_s17  ;;  %v490_v50 = vshll.u32 %v442_v48, 16  ;;  %v540_v55 = vrot.slane %v538_v47, 1  ;;  %v578_v7 = vrot.slane %v442_v48, 1  ;;  %v379_v9 = vunpack.c.l.bf16 %v349_v58 }
  0x34   : > { %637 = vrot.lane.b32.xlu0 %v1763_v46, %s1582_s17  ;;  %v380_v10 = vunpack.c.h.bf16 %v349_v58  ;;  %v431_v14 = vmul.f32 %v1437_v61, %v1670_v0  ;;  %v432_v15 = vmul.f32 %v1438_v5, %v1670_v0  ;;  %v396_v16 = vunpack.c.l.bf16 %v366_v62  ;;  %v1537_v5 = vld [vmem:[%s2194_s3] sm:$0xff]  }
  0x35   : > { %v492_v57 = vrot.slane %v490_v50, 1  ;;  %v1780_v6 = vsel %vm457_vm1, %v536_v54, %v540_v55  ;;  %v428_v17 = vmul.f32 %v1670_v0, %v391_v59  ;;  %v429_v18 = vmul.f32 %v1670_v0, %v392_v60  ;;  %1454 = vmatprep.subr.bf16.mxu0 %v1537_v5  ;;  %1476 = vmatprep.subr.bf16.mxu1 %v1537_v5 }
  0x36   : > { %v393_v19 = vunpack.c.l.bf16 %v363_v4  ;;  %v416_v20 = vmul.f32 %v1670_v0, %v379_v9  ;;  %v417_v21 = vmul.f32 %v1670_v0, %v380_v10  ;;  %v1796_v23 = vpack.c.bf16 %v432_v15, %v431_v14  ;;  %1455 = vmatpush3.bf16.msra.mxu0 %v1537_v5  ;;  %1479 = vmatpush3.bf16.msra.mxu1 %v1537_v5 }
  0x37   : > { %685 = vrot.lane.b32.xlu1 %v1758_v41, %s1583_s18  ;;  %v1783_v11 = vsel %vm457_vm1, %v488_v56, %v492_v57  ;;  %v1800_v27 = vsel %vm570_vm0, %v589_v1, %v590_v2  ;;  %v1803_v28 = vsel %vm570_vm0, %v577_v3, %v578_v7  ;;  %v433_v29 = vmul.f32 %v1670_v0, %v396_v16 }
  0x38   : > { %677 = vrot.lane.b32.xlu0 %v481_v22, %s1583_s18  ;;  %v381_v22 = vunpack.c.l.bf16 %v351_v12  ;;  %v1807_v33 = vpack.c.bf16 %v429_v18, %v428_v17  ;;  %v430_v34 = vmul.f32 %v1670_v0, %v393_v19  ;;  %v596_v35 = vshrl.u32 %v1796_v23, 16 }
  0x39   : > { %v598_v36 = vshll.u32 %v1796_v23, 16  ;;  %v454_v37 = vpack.c.bf16 %v433_v29, %v433_v29  ;;  %v609_v38 = vrot.slane %v1796_v23, 1  ;;  %v397_v39 = vunpack.c.l.bf16 %v367_v24 }
  0x3a   : > { %v398_v40 = vunpack.c.h.bf16 %v367_v24  ;;  %v1817_v42 = vpack.c.bf16 %v417_v21, %v416_v20  ;;  %v418_v44 = vmul.f32 %v1670_v0, %v381_v22  ;;  %v399_v47 = vunpack.c.l.bf16 %v369_v32  ;;  %v1538_v20 = vld [vmem:[%s2194_s3 + $0x8] sm:$0xff]  }
  0x3b   : > { %687 = vrot.lane.b32.xlu1 %v1780_v6, %s1583_s18  ;;  %v600_v45 = vrot.slane %v598_v36, 1  ;;  %v603_v48 = vshll.u32 %v454_v37, 16  ;;  %v610_v49 = vrot.slane %v454_v37, 1  ;;  %v434_v50 = vmul.f32 %v1670_v0, %v397_v39  ;;  %1456 = vmatprep.subr.bf16.mxu0 %v1538_v20 }
  0x3c   : > { %679 = vrot.lane.b32.xlu0 %v1783_v11, %s1583_s18  ;;  %v435_v51 = vmul.f32 %v1670_v0, %v398_v40  ;;  %v436_v54 = vmul.f32 %v1670_v0, %v399_v47  ;;  %v1825_v55 = vpack.c.bf16 %v430_v34, %v430_v34  ;;  %v545_v58 = vshll.u32 %v1807_v33, 16  ;;  %1477 = vmatprep.subr.bf16.mxu1 %v1538_v20  ;;  %v1539_v34 = vld [vmem:[%s2194_s3 + $0x10] ss:$0 sps:$4 sm:$0x33]  }
  0x3d   : > { %v601_v53 = vor.u32 %v600_v45, %v596_v35  ;;  %v1828_v56 = vsel %vm570_vm0, %v609_v38, %v610_v49  ;;  %v1835_v59 = vpack.c.bf16 %v418_v44, %v418_v44  ;;  %v497_v0 = vshll.u32 %v1817_v42, 16  ;;  %1457 = vmatpush3.bf16.msra.mxu0 %v1538_v20  ;;  %1480 = vmatpush3.bf16.msra.mxu1 %v1538_v20 }
  0x3e   : > { %v1830_v57 = vpack.c.bf16 %v435_v51, %v434_v50  ;;  %v456_v60 = vpack.c.bf16 %v436_v54, %v436_v54  ;;  %v543_v7 = vshrl.u32 %v1807_v33, 16  ;;  %v547_v10 = vrot.slane %v545_v58, 1  ;;  %1482 = vmatprep.subr.msk.bf16.mxu0 %vm930_vm2, %v1539_v34  ;;  %1483 = vmatprep.subr.msk.bf16.mxu1 %vm930_vm2, %v1539_v34 }
  0x3f   : > { %701 = vrot.lane.b32.xlu1 %v1735_v8, %s1584_s19  ;;  %v550_v12 = vshll.u32 %v1825_v55, 16  ;;  %v495_v16 = vshrl.u32 %v1817_v42, 16  ;;  %v499_v17 = vrot.slane %v497_v0, 1  ;;  %v502_v18 = vshll.u32 %v1835_v59, 16 }
  0x40   : > { %693 = vrot.lane.b32.xlu0 %v1740_v13, %s1584_s19  ;;  %v605_v13 = vrot.slane %v603_v48, 1  ;;  %v613_v62 = vshrl.u32 %v1830_v57, 16  ;;  %v615_v1 = vshll.u32 %v1830_v57, 16  ;;  %v626_v2 = vrot.slane %v1830_v57, 1 }
  0x41   : > { %v620_v3 = vshll.u32 %v456_v60, 16  ;;  %v627_v4 = vrot.slane %v456_v60, 1  ;;  %v548_v22 = vor.u32 %v547_v10, %v543_v7  ;;  %v552_v24 = vrot.slane %v550_v12, 1 }
  0x42   : > { %v1839_v61 = vsel %vm457_vm1, %v601_v53, %v605_v13  ;;  %v617_v9 = vrot.slane %v615_v1, 1  ;;  %v500_v29 = vor.u32 %v499_v17, %v495_v16  ;;  %v504_v32 = vrot.slane %v502_v18, 1 }
  0x43   : > { %703 = vrot.lane.b32.xlu1 %v1800_v27, %s1584_s19  ;;  %v622_v14 = vrot.slane %v620_v3, 1  ;;  %v1854_v15 = vsel %vm570_vm0, %v626_v2, %v627_v4  ;;  %v553_v35 = vsel %vm457_vm1, %v548_v22, %v552_v24  ;;  %v932_v36 = vsel %vm930_vm2, %v1539_v34, 0 }
  0x44   : > { %695 = vrot.lane.b32.xlu0 %v1803_v28, %s1584_s19  ;;  %v618_v19 = vor.u32 %v617_v9, %v613_v62  ;;  %v505_v37 = vsel %vm457_vm1, %v500_v29, %v504_v32  ;;  %1459 = vmatpush3.bf16.msra.mxu0 %v932_v36  ;;  %v592_v38 = vrot.slane %v1807_v33, 1  ;;  %v593_v39 = vrot.slane %v1825_v55, 1 }
  0x45   : > { %1481 = vmatpush3.bf16.msra.mxu1 %v932_v36  ;;  %v580_v40 = vrot.slane %v1817_v42, 1  ;;  %v581_v44 = vrot.slane %v1835_v59, 1 }
  0x46   : > { %v1864_v21 = vsel %vm457_vm1, %v618_v19, %v622_v14  ;;  %v594_v45 = vsel %vm570_vm0, %v592_v38, %v593_v39 }
  0x47   : > { %717 = vrot.lane.b32.xlu1 %v1693_v30, %s1585_s29  ;;  %v582_v47 = vsel %vm570_vm0, %v580_v40, %v581_v44 }
  0x48   : > { %709 = vrot.lane.b32.xlu0 %v1695_v31, %s1585_s29 }
  0x4b   : > { %719 = vrot.lane.b32.xlu1 %v1807_v33, %s1585_s29 }
  0x4c   : > { %711 = vrot.lane.b32.xlu0 %v1817_v42, %s1585_s29 }
  0x4f   : > { %733 = vrot.lane.b32.xlu1 %v1780_v6, %s1586_s10 }
  0x50   : > { %725 = vrot.lane.b32.xlu0 %v1783_v11, %s1586_s10 }
  0x53   : > { %735 = vrot.lane.b32.xlu1 %v553_v35, %s1586_s10 }
  0x54   : > { %727 = vrot.lane.b32.xlu0 %v505_v37, %s1586_s10 }
  0x57   : > { %749 = vrot.lane.b32.xlu1 %v1800_v27, %s1587_s11 }
  0x58   : > { %741 = vrot.lane.b32.xlu0 %v1803_v28, %s1587_s11 }
  0x5b   : > { %641 = vrot.lane.b32.xlu1 %v1780_v6, %s1582_s17 }
  0x5c   : > { %633 = vrot.lane.b32.xlu0 %v1783_v11, %s1582_s17 }
  0x5f   : > { %751 = vrot.lane.b32.xlu1 %v594_v45, %s1587_s11 }
  0x60   : > { %743 = vrot.lane.b32.xlu0 %v582_v47, %s1587_s11 }
  0x63   : > { %643 = vrot.lane.b32.xlu1 %v553_v35, %s1582_s17 }
  0x64   : > { %635 = vrot.lane.b32.xlu0 %v505_v37, %s1582_s17 }
  0x67   : > { %657 = vrot.lane.b32.xlu1 %v1800_v27, %s1581_s16 }
  0x68   : > { %649 = vrot.lane.b32.xlu0 %v1803_v28, %s1581_s16 }
  0x6b   : > { %659 = vrot.lane.b32.xlu1 %v594_v45, %s1581_s16 }
  0x6c   : > { %651 = vrot.lane.b32.xlu0 %v582_v47, %s1581_s16 }
  0x6f   : > { %673 = vrot.lane.b32.xlu1 %v1807_v33, %s1580_s15 }
  0x70   : > { %665 = vrot.lane.b32.xlu0 %v1817_v42, %s1580_s15 }
  0x73   : > { %675 = vrot.lane.b32.xlu1 %v1796_v23, %s1580_s15 }
  0x74   : > { %667 = vrot.lane.b32.xlu0 %v1707_v43, %s1580_s15  ;;  %s1958_s15 = scalar_lea.vmem %s2195_s4, %s1399_s21 }
  0x75   : > { %v1054_v49 = vld [vmem:[%s1958_s15] sm:$0xff]  ;;  %v1056_v51 = vld [vmem:[%s1958_s15 + $0x10] sm:$0xff]  ;;  %v1057_v54 = vld [vmem:[%s1958_s15 + $0x18] sm:$0xff] }
  0x76   : > { %v1060_v58 = vld [vmem:[%s1958_s15 + $0x30] sm:$0xff]  ;;  %v1061_v0 = vld [vmem:[%s1958_s15 + $0x38] sm:$0xff]  ;;  %v1063_v1 = vld [vmem:[%s1958_s15 + $0x48] sm:$0xff] }
  0x77   : > { %689 = vrot.lane.b32.xlu1 %v553_v35, %s1583_s18  ;;  %v1064_v3 = vld [vmem:[%s1958_s15 + $0x50] sm:$0xff]  ;;  %v1065_v5 = vld [vmem:[%s1958_s15 + $0x58] sm:$0xff]  ;;  %v1066_v9 = vld [vmem:[%s1958_s15 + $0x60] sm:$0xff] }
  0x78   : > { %681 = vrot.lane.b32.xlu0 %v505_v37, %s1583_s18  ;;  %v1067_v12 = vld [vmem:[%s1958_s15 + $0x68] sm:$0xff]  ;;  %v1069_v17 = vld [vmem:[%s1958_s15 + $0x78] sm:$0xff] }
  0x7b   : > { %691 = vrot.lane.b32.xlu1 %v1839_v61, %s1583_s18 }
  0x7c   : > { %683 = vrot.lane.b32.xlu0 %v1763_v46, %s1583_s18  ;;  %s313_s18 = scalar_lea.vmem %s2192_s1, %s2209_s22 }
  0x7f   : > { %705 = vrot.lane.b32.xlu1 %v594_v45, %s1584_s19 }
  0x80   : > { %697 = vrot.lane.b32.xlu0 %v582_v47, %s1584_s19 }
  0x83   : > { %707 = vrot.lane.b32.xlu1 %v1828_v56, %s1584_s19 }
  0x84   : > { %699 = vrot.lane.b32.xlu0 %v1727_v63, %s1584_s19  ;;  %s1401_s19 = sshll.u32 %s2209_s22, 5 }
  0x87   : > { %721 = vrot.lane.b32.xlu1 %v1796_v23, %s1585_s29  ;;  %v1588_v23 = vmov 0  }
  0x88   : > { %713 = vrot.lane.b32.xlu0 %v1707_v43, %s1585_s29  ;;  %1536 = vset.pattern.permute.xlu1 %v1588_v23 }
  0x89   : > { %1535 = vset.pattern.permute.xlu0 %v1588_v23 }
  0x8b   : > { %723 = vrot.lane.b32.xlu1 %v1830_v57, %s1585_s29 }
  0x8c   : > { %715 = vrot.lane.b32.xlu0 %v1688_v25, %s1585_s29  ;;  %s2103_s29 = sadd.s32 %s1401_s19, %s2211_s12 }
  0x8d   : > { %s1402_s22 = sshll.u32 %s2103_s29, 3 }
  0x8e   : > { %s2118_s8 = scalar_lea.vmem %s2197_s6, %s1402_s22 }
  0x8f   : > { %737 = vrot.lane.b32.xlu1 %v1839_v61, %s1586_s10  ;;  %v1062_v61 = vld [vmem:[%s1958_s15 + $0x40] sm:$0xff] }
  0x90   : > { %729 = vrot.lane.b32.xlu0 %v1763_v46, %s1586_s10 }
  0x91   : > { %v1936_v6 = vpop.permute.xlu1 %669  ;;  %v1938_v11 = vpop.permute.xlu0 %661 }
  0x93   : > { %739 = vrot.lane.b32.xlu1 %v1864_v21, %s1586_s10 }
  0x94   : > { %731 = vrot.lane.b32.xlu0 %v1758_v41, %s1586_s10 }
  0x95   : > { %v1946_v27 = vpop.permute.xlu1 %671  ;;  %v1948_v28 = vpop.permute.xlu0 %663 }
  0x97   : > { %753 = vrot.lane.b32.xlu1 %v1828_v56, %s1587_s11  ;;  %v1059_v56 = vld [vmem:[%s1958_s15 + $0x28] sm:$0xff] }
  0x98   : > { %745 = vrot.lane.b32.xlu0 %v1727_v63, %s1587_s11  ;;  %v1055_v63 = vld [vmem:[%s1958_s15 + $0x8] sm:$0xff] }
  0x99   : > { %v654_v46 = vpop.permute.xlu1 %653 }
  0x9a   : > { %v646_v41 = vpop.permute.xlu0 %645 }
  0x9b   : > { %755 = vrot.lane.b32.xlu1 %v1854_v15, %s1587_s11  ;;  %v1068_v15 = vld [vmem:[%s1958_s15 + $0x70] sm:$0xff] }
  0x9c   : > { %747 = vrot.lane.b32.xlu0 %v1735_v8, %s1587_s11  ;;  %v1058_v8 = vld [vmem:[%s1958_s15 + $0x20] sm:$0xff] }
  0x9d   : > { %v1965_v48 = vpop.permute.xlu1 %655 }
  0x9e   : > { %v1968_v50 = vpop.permute.xlu0 %647 }
  0x9f   : > { %1077 = vperm.xlu1 %1536, %v1055_v63  }
  0xa0   : > { %1072 = vperm.xlu0 %1535, %v1054_v49  }
  0xa1   : > { %v1971_v53 = vpop.permute.xlu1 %631 }
  0xa2   : > { %v630_v55 = vpop.permute.xlu0 %629  ;;  %v761_v44 = vsel %vm757_vm3, %v1690_v26, %v1971_v53 }
  0xa3   : > { %1082 = vperm.xlu1 %1536, %v1056_v51   ;;  %v759_v22 = vsel %vm757_vm3, %v1719_v52, %v630_v55  ;;  %v778_v26 = vsel %vm774_vm4, %v761_v44, %v1968_v50 }
  0xa4   : > { %1087 = vperm.xlu0 %1535, %v1057_v54   ;;  %v776_v34 = vsel %vm774_vm4, %v759_v22, %v646_v41  ;;  %v795_v54 = vsel %vm791_vm5, %v778_v26, %v1948_v28 }
  0xa5   : > { %v640_v13 = vpop.permute.xlu1 %639  ;;  %v793_v37 = vsel %vm791_vm5, %v776_v34, %v1938_v11 }
  0xa6   : > { %v638_v57 = vpop.permute.xlu0 %637  ;;  %v769_v38 = vsel %vm757_vm3, %v1688_v25, %v640_v13 }
  0xa7   : > { %1092 = vperm.xlu1 %1536, %v1058_v8   ;;  %v767_v19 = vsel %vm757_vm3, %v1707_v43, %v638_v57  ;;  %v786_v25 = vsel %vm774_vm4, %v769_v38, %v1965_v48 }
  0xa8   : > { %1097 = vperm.xlu0 %1535, %v1059_v56   ;;  %v784_v24 = vsel %vm774_vm4, %v767_v19, %v654_v46  ;;  %v803_v51 = vsel %vm791_vm5, %v786_v25, %v1946_v27 }
  0xa9   : > { %v686_v59 = vpop.permute.xlu1 %685  ;;  %v801_v35 = vsel %vm791_vm5, %v784_v24, %v1936_v6 }
  0xaa   : > { %v678_v60 = vpop.permute.xlu0 %677  ;;  %v818_v36 = vsel %vm808_vm6, %v801_v35, %v686_v59 }
  0xab   : > { %1102 = vperm.xlu1 %1536, %v1060_v58   ;;  %v810_v39 = vsel %vm808_vm6, %v793_v37, %v678_v60 }
  0xac   : > { %1107 = vperm.xlu0 %1535, %v1061_v0  }
  0xad   : > { %v1979_v62 = vpop.permute.xlu1 %687 }
  0xae   : > { %v1982_v2 = vpop.permute.xlu0 %679  ;;  %v820_v48 = vsel %vm808_vm6, %v803_v51, %v1979_v62 }
  0xaf   : > { %1112 = vperm.xlu1 %1536, %v1062_v61   ;;  %v812_v50 = vsel %vm808_vm6, %v795_v54, %v1982_v2 }
  0xb0   : > { %1117 = vperm.xlu0 %1535, %v1063_v1  }
  0xb1   : > { %v702_v4 = vpop.permute.xlu1 %701 }
  0xb2   : > { %v694_v7 = vpop.permute.xlu0 %693  ;;  %v835_v40 = vsel %vm825_vm7, %v818_v36, %v702_v4 }
  0xb3   : > { %1122 = vperm.xlu1 %1536, %v1064_v3   ;;  %v827_v45 = vsel %vm825_vm7, %v810_v39, %v694_v7 }
  0xb4   : > { %1127 = vperm.xlu0 %1535, %v1065_v5  }
  0xb5   : > { %v704_v10 = vpop.permute.xlu1 %703 }
  0xb6   : > { %v696_v14 = vpop.permute.xlu0 %695  ;;  %v837_v8 = vsel %vm825_vm7, %v820_v48, %v704_v10 }
  0xb7   : > { %1132 = vperm.xlu1 %1536, %v1066_v9   ;;  %v829_v13 = vsel %vm825_vm7, %v812_v50, %v696_v14 }
  0xb8   : > { %1137 = vperm.xlu0 %1535, %v1067_v12  }
  0xb9   : > { %v718_v16 = vpop.permute.xlu1 %717 }
  0xba   : > { %v710_v18 = vpop.permute.xlu0 %709  ;;  %v852_v47 = vsel %vm842_vm8, %v835_v40, %v718_v16 }
  0xbb   : > { %1142 = vperm.xlu1 %1536, %v1068_v15   ;;  %v844_v6 = vsel %vm842_vm8, %v827_v45, %v710_v18 }
  0xbc   : > { %1147 = vperm.xlu0 %1535, %v1069_v17  }
  0xbd   : > { %v720_v20 = vpop.permute.xlu1 %719 }
  0xbe   : > { %v712_v21 = vpop.permute.xlu0 %711  ;;  %v854_v56 = vsel %vm842_vm8, %v837_v8, %v720_v20 }
  0xbf   : > { %v846_v57 = vsel %vm842_vm8, %v829_v13, %v712_v21 }
  0xc1   : > { %v734_v29 = vpop.permute.xlu1 %733 }
  0xc2   : > { %v726_v32 = vpop.permute.xlu0 %725  ;;  %v869_v11 = vsel %vm859_vm9, %v852_v47, %v734_v29 }
  0xc3   : > { %v861_v46 = vsel %vm859_vm9, %v844_v6, %v726_v32 }
  0xc5   : > { %v736_v43 = vpop.permute.xlu1 %735 }
  0xc6   : > { %v728_v52 = vpop.permute.xlu0 %727  ;;  %v871_v27 = vsel %vm859_vm9, %v854_v56, %v736_v43 }
  0xc7   : > { %v863_v59 = vsel %vm859_vm9, %v846_v57, %v728_v52 }
  0xc9   : > { %v750_v23 = vpop.permute.xlu1 %749 }
  0xca   : > { %v742_v41 = vpop.permute.xlu0 %741  ;;  %v886_v63 = vsel %vm876_vm10, %v869_v11, %v750_v23 }
  0xcb   : > { %v878_v49 = vsel %vm876_vm10, %v861_v46, %v742_v41  ;;  %1468 = vmatprep.mubr.msk.bf16.mxu1 %vm913_vm11, %v886_v63 }
  0xcc   : > { %1460 = vmatprep.mubr.msk.bf16.mxu0 %vm913_vm11, %v878_v49 }
  0xcd   : > { %v642_v53 = vpop.permute.xlu1 %641 }
  0xce   : > { %v634_v55 = vpop.permute.xlu0 %633  ;;  %v771_v35 = vsel %vm757_vm3, %v1693_v30, %v642_v53 }
  0xcf   : > { %v763_v43 = vsel %vm757_vm3, %v1695_v31, %v634_v55 }
  0xd1   : > { %v752_v58 = vpop.permute.xlu1 %751 }
  0xd2   : > { %v888_v0 = vsel %vm876_vm10, %v871_v27, %v752_v58  ;;  %v744_v28 = vpop.permute.xlu0 %743 }
  0xd3   : > { %v880_v60 = vsel %vm876_vm10, %v863_v59, %v744_v28  ;;  %1469 = vmatmul.mubr.msk.bf16.vlgmr.msra.gmra.mrb[0].mxu1 %vm913_vm11, %v888_v0 }
  0xd4   : > { %1461 = vmatmul.mubr.msk.bf16.vlgmr.msra.gmra.mrb[0].mxu0 %vm913_vm11, %v880_v60 }
  0xd5   : > { %v644_v61 = vpop.permute.xlu1 %643 }
  0xd6   : > { %v636_v62 = vpop.permute.xlu0 %635  ;;  %v773_v45 = vsel %vm757_vm3, %v1807_v33, %v644_v61 }
  0xd7   : > { %v765_v31 = vsel %vm757_vm3, %v1817_v42, %v636_v62 }
  0xd9   : > { %v658_v1 = vpop.permute.xlu1 %657 }
  0xda   : > { %v650_v2 = vpop.permute.xlu0 %649  ;;  %v788_v36 = vsel %vm774_vm4, %v771_v35, %v658_v1 }
  0xdb   : > { %v780_v37 = vsel %vm774_vm4, %v763_v43, %v650_v2 }
  0xdd   : > { %v660_v3 = vpop.permute.xlu1 %659 }
  0xde   : > { %v652_v4 = vpop.permute.xlu0 %651  ;;  %v790_v6 = vsel %vm774_vm4, %v773_v45, %v660_v3 }
  0xdf   : > { %v782_v25 = vsel %vm774_vm4, %v765_v31, %v652_v4 }
  0xe1   : > { %v674_v5 = vpop.permute.xlu1 %673 }
  0xe2   : > { %v666_v7 = vpop.permute.xlu0 %665  ;;  %v805_v52 = vsel %vm791_vm5, %v788_v36, %v674_v5 }
  0xe3   : > { %v797_v39 = vsel %vm791_vm5, %v780_v37, %v666_v7 }
  0xe5   : > { %v676_v9 = vpop.permute.xlu1 %675 }
  0xe6   : > { %v668_v10 = vpop.permute.xlu0 %667  ;;  %v807_v46 = vsel %vm791_vm5, %v790_v6, %v676_v9  ;;  %v2091_v9 = vld [vmem:[%s313_s18] ss:$0 sm:$0xff] }
  0xe7   : > { %v799_v26 = vsel %vm791_vm5, %v782_v25, %v668_v10 }
  0xe9   : > { %v690_v12 = vpop.permute.xlu1 %689 }
  0xea   : > { %v682_v14 = vpop.permute.xlu0 %681  ;;  %v822_v40 = vsel %vm808_vm6, %v805_v52, %v690_v12 }
  0xeb   : > { %v814_v30 = vsel %vm808_vm6, %v797_v39, %v682_v14 }
  0xed   : > { %v692_v15 = vpop.permute.xlu1 %691 }
  0xee   : > { %v684_v16 = vpop.permute.xlu0 %683  ;;  %v824_v49 = vsel %vm808_vm6, %v807_v46, %v692_v15 }
  0xef   : > { %v816_v48 = vsel %vm808_vm6, %v799_v26, %v684_v16 }
  0xf1   : > { %v706_v17 = vpop.permute.xlu1 %705 }
  0xf2   : > { %v698_v18 = vpop.permute.xlu0 %697  ;;  %v839_v47 = vsel %vm825_vm7, %v822_v40, %v706_v17 }
  0xf3   : > { %v831_v11 = vsel %vm825_vm7, %v814_v30, %v698_v18 }
  0xf5   : > { %v708_v19 = vpop.permute.xlu1 %707 }
  0xf6   : > { %v700_v20 = vpop.permute.xlu0 %699  ;;  %v841_v54 = vsel %vm825_vm7, %v824_v49, %v708_v19  ;;  %v2099_v19 = vld [vmem:[%s2196_s5] ss:$0 sm:$0xff] }
  0xf7   : > { %v833_v50 = vsel %vm825_vm7, %v816_v48, %v700_v20 }
  0xf9   : > { %v722_v21 = vpop.permute.xlu1 %721 }
  0xfa   : > { %v714_v22 = vpop.permute.xlu0 %713  ;;  %v856_v23 = vsel %vm842_vm8, %v839_v47, %v722_v21 }
  0xfb   : > { %v848_v41 = vsel %vm842_vm8, %v831_v11, %v714_v22 }
  0xfd   : > { %v724_v24 = vpop.permute.xlu1 %723 }
  0xfe   : > { %v716_v29 = vpop.permute.xlu0 %715  ;;  %v858_v8 = vsel %vm842_vm8, %v841_v54, %v724_v24 }
  0xff   : > { %v850_v13 = vsel %vm842_vm8, %v833_v50, %v716_v29 }
 0x101   : > { %v738_v32 = vpop.permute.xlu1 %737 }
 0x102   : > { %v730_v34 = vpop.permute.xlu0 %729  ;;  %v873_v33 = vsel %vm859_vm9, %v856_v23, %v738_v32 }
 0x103   : > { %v865_v42 = vsel %vm859_vm9, %v848_v41, %v730_v34 }
 0x105   : > { %v740_v38 = vpop.permute.xlu1 %739 }
 0x106   : > { %v732_v44 = vpop.permute.xlu0 %731  ;;  %v875_v56 = vsel %vm859_vm9, %v858_v8, %v740_v38 }
 0x107   : > { %v867_v27 = vsel %vm859_vm9, %v850_v13, %v732_v44 }
 0x109   : > { %v754_v63 = vpop.permute.xlu1 %753 }
 0x10a   : > { %v890_v51 = vsel %vm876_vm10, %v873_v33, %v754_v63  ;;  %v746_v53 = vpop.permute.xlu0 %745 }
 0x10b   : > { %v882_v55 = vsel %vm876_vm10, %v865_v42, %v746_v53  ;;  %1472 = vmatprep.mubr.msk.bf16.mxu1 %vm913_vm11, %v890_v51 }
 0x10c   : > { %1464 = vmatprep.mubr.msk.bf16.mxu0 %vm913_vm11, %v882_v55 }
 0x10d   : > { %v756_v57 = vpop.permute.xlu1 %755 }
 0x10e   : > { %v892_v58 = vsel %vm876_vm10, %v875_v56, %v756_v57  ;;  %v748_v59 = vpop.permute.xlu0 %747 }
 0x10f   : > { %v884_v0 = vsel %vm876_vm10, %v867_v27, %v748_v59  ;;  %1473 = vmatmul.mubr.msk.bf16.gmra.mrb[4].mxu1 %vm913_vm11, %v892_v58 }
 0x110   : > { %1465 = vmatmul.mubr.msk.bf16.gmra.mrb[4].mxu0 %vm913_vm11, %v884_v0 }
 0x11e   : > { %v1078_v28 = vpop.permute.xlu1 %1077 }
 0x11f   : > { %v1073_v60 = vpop.permute.xlu0 %1072 }
 0x122   : > { %v1083_v61 = vpop.permute.xlu1 %1082 }
 0x123   : > { %v1088_v62 = vpop.permute.xlu0 %1087 }
 0x126   : > { %v2079_v1 = vpop.permute.xlu1 %1092 }
 0x127   : > { %v2081_v2 = vpop.permute.xlu0 %1097 }
 0x12a   : > { %v2083_v3 = vpop.permute.xlu1 %1102 }
 0x12b   : > { %v2085_v4 = vpop.permute.xlu0 %1107 }
 0x12e   : > { %v1113_v5 = vpop.permute.xlu1 %1112 }
 0x12f   : > { %v1118_v7 = vpop.permute.xlu0 %1117 }
 0x132   : > { %v1123_v10 = vpop.permute.xlu1 %1122 }
 0x133   : > { %v1128_v14 = vpop.permute.xlu0 %1127 }
 0x1a6   : > { %v1470_v12 = vpop.f32.mrb[0].mxu1 }
 0x1a7   : > { %v1462_v15 = vpop.f32.mrb[0].mxu0  ;;  %v1048_v16 = vmul.f32 %v1470_v12, %v2091_v9  ;;  %v1000_v17 = vpop.f32.mrb[1].mxu1 }
 0x1a8   : > { %v1040_v18 = vmul.f32 %v1462_v15, %v2091_v9  ;;  %v968_v20 = vpop.f32.mrb[1].mxu0  ;;  %v1046_v21 = vmul.f32 %v2091_v9, %v1000_v17  ;;  %v1471_v22 = vpop.f32.mrb[2].mxu1 }
 0x1a9   : > { %v1038_v24 = vmul.f32 %v2091_v9, %v968_v20  ;;  %v1160_v29 = vadd.f32 %v1123_v10, %v1048_v16  ;;  %v1463_v32 = vpop.f32.mrb[2].mxu0  ;;  %v1049_v34 = vmul.f32 %v1471_v22, %v2091_v9  ;;  %v1003_v35 = vpop.f32.mrb[3].mxu1 }
 0x1aa   : > { %v1152_v43 = vadd.f32 %v1083_v61, %v1040_v18  ;;  %v1158_v36 = vadd.f32 %v1113_v5, %v1046_v21  ;;  %v1041_v37 = vmul.f32 %v1463_v32, %v2091_v9  ;;  %v971_v52 = vpop.f32.mrb[3].mxu0  ;;  %v1047_v38 = vmul.f32 %v2091_v9, %v1003_v35  ;;  %v1133_v10 = vpop.permute.xlu1 %1132 }
 0x1ab   : > { %v1150_v39 = vadd.f32 %v1073_v60, %v1038_v24  ;;  %v1183_v40 = vadd.f32 %v2099_v19, %v1160_v29  ;;  %v1039_v44 = vmul.f32 %v2091_v9, %v971_v52  ;;  %v1161_v45 = vadd.f32 %v1128_v14, %v1049_v34  ;;  %v1138_v12 = vpop.permute.xlu0 %1137 }
 0x1ac   : > { %v1175_v30 = vadd.f32 %v2099_v19, %v1152_v43  ;;  %v1181_v47 = vadd.f32 %v2099_v19, %v1158_v36  ;;  %v1153_v31 = vadd.f32 %v1088_v62, %v1041_v37  ;;  %v1159_v6 = vadd.f32 %v1118_v7, %v1047_v38 }
 0x1ad   : > { %v1173_v11 = vadd.f32 %v2099_v19, %v1150_v39  ;;  %vm1199_vm12 = vcmp.ge.f32.partialorder %v1183_v40, 0.0  ;;  %v1215_v23 = vmul.f32 0.2, %v1183_v40  ;;  %v1151_v25 = vadd.f32 %v1078_v28, %v1039_v44 }
 0x1ae   : > { %vm1191_vm13 = vcmp.ge.f32.partialorder %v1175_v30, 0.0  ;;  %v1207_v46 = vmul.f32 0.2, %v1175_v30  ;;  %vm1197_vm14 = vcmp.ge.f32.partialorder %v1181_v47, 0.0  ;;  %v1213_v41 = vmul.f32 0.2, %v1181_v47  ;;  %v1143_v14 = vpop.permute.xlu1 %1142 }
 0x1af   : > { %vm1189_vm15 = vcmp.ge.f32.partialorder %v1173_v11, 0.0  ;;  %v1205_v33 = vmul.f32 0.2, %v1173_v11  ;;  %v1231_v63 = vsel %vm1199_vm12, %v1183_v40, %v1215_v23  ;;  %v1176_v26 = vadd.f32 %v2099_v19, %v1153_v31  ;;  %v1148_v36 = vpop.permute.xlu0 %1147 }
 0x1b0   : > { %v1223_v49 = vsel %vm1191_vm13, %v1175_v30, %v1207_v46  ;;  %v1229_v42 = vsel %vm1197_vm14, %v1181_v47, %v1213_v41  ;;  %v1247_v51 = vmul.f32 1.4142135, %v1231_v63  ;;  %v1174_v53 = vadd.f32 %v2099_v19, %v1151_v25 }
 0x1b1   : > { %v1239_v48 = vmul.f32 1.4142135, %v1223_v49  ;;  %v1221_v54 = vsel %vm1189_vm15, %v1173_v11, %v1205_v33  ;;  %v1245_v55 = vmul.f32 1.4142135, %v1229_v42  ;;  %vm1192_vm0 = vcmp.ge.f32.partialorder %v1176_v26, 0.0 }
 0x1b2   : > { %v1237_v50 = vmul.f32 1.4142135, %v1221_v54  ;;  %1263 = vst.msk [vmem:[%s2118_s8 + $0x50] sm:$0xff] %vm774_vm4, %v1247_v51  ;;  %v1208_v8 = vmul.f32 0.2, %v1176_v26  ;;  %vm1190_vm1 = vcmp.ge.f32.partialorder %v1174_v53, 0.0  ;;  %v1182_v13 = vadd.f32 %v2099_v19, %v1159_v6 }
 0x1b3   : > { %1255 = vst.msk [vmem:[%s2118_s8 + $0x10] sm:$0xff] %vm774_vm4, %v1239_v48  ;;  %1261 = vst.msk [vmem:[%s2118_s8 + $0x40] sm:$0xff] %vm774_vm4, %v1245_v55  ;;  %v1206_v56 = vmul.f32 0.2, %v1174_v53  ;;  %v1184_v57 = vadd.f32 %v2099_v19, %v1161_v45 }
 0x1b4   : > { %1253 = vst.msk [vmem:[%s2118_s8] sm:$0xff] %vm774_vm4, %v1237_v50  ;;  %v1224_v27 = vsel %vm1192_vm0, %v1176_v26, %v1208_v8  ;;  %vm1198_vm2 = vcmp.ge.f32.partialorder %v1182_v13, 0.0  ;;  %v1214_v58 = vmul.f32 0.2, %v1182_v13 }
 0x1b5   : > { %v1240_v59 = vmul.f32 1.4142135, %v1224_v27  ;;  %v1222_v0 = vsel %vm1190_vm1, %v1174_v53, %v1206_v56  ;;  %vm1200_vm3 = vcmp.ge.f32.partialorder %v1184_v57, 0.0  ;;  %v1216_v28 = vmul.f32 0.2, %v1184_v57 }
 0x1b6   : > { %v1238_v60 = vmul.f32 1.4142135, %v1222_v0  ;;  %v1230_v61 = vsel %vm1198_vm2, %v1182_v13, %v1214_v58 }
 0x1b7   : > { %1256 = vst.msk [vmem:[%s2118_s8 + $0x18] sm:$0xff] %vm774_vm4, %v1240_v59  ;;  %v1246_v62 = vmul.f32 1.4142135, %v1230_v61  ;;  %v1232_v5 = vsel %vm1200_vm3, %v1184_v57, %v1216_v28 }
 0x1b8   : > { %1254 = vst.msk [vmem:[%s2118_s8 + $0x8] sm:$0xff] %vm774_vm4, %v1238_v60  ;;  %v1248_v7 = vmul.f32 1.4142135, %v1232_v5 }
 0x1b9   : > { %1262 = vst.msk [vmem:[%s2118_s8 + $0x48] sm:$0xff] %vm774_vm4, %v1246_v62 }
 0x1ba   : > { %1264 = vst.msk [vmem:[%s2118_s8 + $0x58] sm:$0xff] %vm774_vm4, %v1248_v7 }
 0x1e2   : > { %v1474_v15 = vpop.f32.mrb[4].mxu1 }
 0x1e3   : > { %v1466_v16 = vpop.f32.mrb[4].mxu0  ;;  %v1052_v17 = vmul.f32 %v1474_v15, %v2091_v9  ;;  %v1016_v18 = vpop.f32.mrb[5].mxu1 }
 0x1e4   : > { %v1044_v20 = vmul.f32 %v1466_v16, %v2091_v9  ;;  %v984_v21 = vpop.f32.mrb[5].mxu0  ;;  %v1050_v22 = vmul.f32 %v2091_v9, %v1016_v18  ;;  %v1475_v24 = vpop.f32.mrb[6].mxu1 }
 0x1e5   : > { %v1164_v29 = vadd.f32 %v1143_v14, %v1052_v17  ;;  %v1042_v32 = vmul.f32 %v2091_v9, %v984_v21  ;;  %v1467_v34 = vpop.f32.mrb[6].mxu0  ;;  %v1053_v35 = vmul.f32 %v1475_v24, %v2091_v9  ;;  %v1019_v43 = vpop.f32.mrb[7].mxu1 }
 0x1e6   : > { %v1156_v37 = vadd.f32 %v2083_v3, %v1044_v20  ;;  %v1162_v52 = vadd.f32 %v1133_v10, %v1050_v22  ;;  %v1045_v38 = vmul.f32 %v1467_v34, %v2091_v9  ;;  %v987_v39 = vpop.f32.mrb[7].mxu0  ;;  %v1051_v40 = vmul.f32 %v2091_v9, %v1019_v43 }
 0x1e7   : > { %v1187_v44 = vadd.f32 %v2099_v19, %v1164_v29  ;;  %v1154_v45 = vadd.f32 %v2079_v1, %v1042_v32  ;;  %v1165_v30 = vadd.f32 %v1148_v36, %v1053_v35  ;;  %v1043_v47 = vmul.f32 %v2091_v9, %v987_v39 }
 0x1e8   : > { %v1179_v31 = vadd.f32 %v2099_v19, %v1156_v37  ;;  %v1185_v6 = vadd.f32 %v2099_v19, %v1162_v52  ;;  %v1157_v11 = vadd.f32 %v2085_v4, %v1045_v38  ;;  %v1163_v3 = vadd.f32 %v1138_v12, %v1051_v40 }
 0x1e9   : > { %vm1203_vm5 = vcmp.ge.f32.partialorder %v1187_v44, 0.0  ;;  %v1219_v23 = vmul.f32 0.2, %v1187_v44  ;;  %v1177_v25 = vadd.f32 %v2099_v19, %v1154_v45  ;;  %v1188_v46 = vadd.f32 %v2099_v19, %v1165_v30 }
 0x1ea   : > { %vm1195_vm6 = vcmp.ge.f32.partialorder %v1179_v31, 0.0  ;;  %v1211_v41 = vmul.f32 0.2, %v1179_v31  ;;  %vm1201_vm7 = vcmp.ge.f32.partialorder %v1185_v6, 0.0  ;;  %v1217_v1 = vmul.f32 0.2, %v1185_v6 }
 0x1eb   : > { %v1235_v33 = vsel %vm1203_vm5, %v1187_v44, %v1219_v23  ;;  %vm1193_vm8 = vcmp.ge.f32.partialorder %v1177_v25, 0.0  ;;  %v1209_v9 = vmul.f32 0.2, %v1177_v25  ;;  %v1180_v63 = vadd.f32 %v2099_v19, %v1157_v11 }
 0x1ec   : > { %v1227_v4 = vsel %vm1195_vm6, %v1179_v31, %v1211_v41  ;;  %v1251_v26 = vmul.f32 1.4142135, %v1235_v33  ;;  %v1233_v49 = vsel %vm1201_vm7, %v1185_v6, %v1217_v1  ;;  %vm1204_vm9 = vcmp.ge.f32.partialorder %v1188_v46, 0.0 }
 0x1ed   : > { %v1243_v42 = vmul.f32 1.4142135, %v1227_v4  ;;  %v1225_v51 = vsel %vm1193_vm8, %v1177_v25, %v1209_v9  ;;  %v1249_v53 = vmul.f32 1.4142135, %v1233_v49  ;;  %vm1196_vm10 = vcmp.ge.f32.partialorder %v1180_v63, 0.0 }
 0x1ee   : > { %1267 = vst.msk [vmem:[%s2118_s8 + $0x70] sm:$0xff] %vm774_vm4, %v1251_v26  ;;  %v1241_v48 = vmul.f32 1.4142135, %v1225_v51  ;;  %v1212_v54 = vmul.f32 0.2, %v1180_v63  ;;  %v1155_v50 = vadd.f32 %v2081_v2, %v1043_v47  ;;  %v1186_v8 = vadd.f32 %v2099_v19, %v1163_v3 }
 0x1ef   : > { %v1220_v55 = vmul.f32 0.2, %v1188_v46  ;;  %1259 = vst.msk [vmem:[%s2118_s8 + $0x30] sm:$0xff] %vm774_vm4, %v1243_v42  ;;  %1265 = vst.msk [vmem:[%s2118_s8 + $0x60] sm:$0xff] %vm774_vm4, %v1249_v53 }
 0x1f0   : > { %1257 = vst.msk [vmem:[%s2118_s8 + $0x20] sm:$0xff] %vm774_vm4, %v1241_v48  ;;  %v1228_v13 = vsel %vm1196_vm10, %v1180_v63, %v1212_v54  ;;  %v1178_v57 = vadd.f32 %v2099_v19, %v1155_v50  ;;  %vm1202_vm11 = vcmp.ge.f32.partialorder %v1186_v8, 0.0  ;;  %v1218_v2 = vmul.f32 0.2, %v1186_v8 }
 0x1f1   : > { %v1236_v56 = vsel %vm1204_vm9, %v1188_v46, %v1220_v55  ;;  %v1244_v27 = vmul.f32 1.4142135, %v1228_v13 }
 0x1f2   : > { %v1252_v58 = vmul.f32 1.4142135, %v1236_v56  ;;  %vm1194_vm12 = vcmp.ge.f32.partialorder %v1178_v57, 0.0  ;;  %v1210_v59 = vmul.f32 0.2, %v1178_v57  ;;  %v1234_v28 = vsel %vm1202_vm11, %v1186_v8, %v1218_v2 }
 0x1f3   : > { %1260 = vst.msk [vmem:[%s2118_s8 + $0x38] sm:$0xff] %vm774_vm4, %v1244_v27  ;;  %v1250_v61 = vmul.f32 1.4142135, %v1234_v28 }
 0x1f4   : > { %1268 = vst.msk [vmem:[%s2118_s8 + $0x78] sm:$0xff] %vm774_vm4, %v1252_v58  ;;  %v1226_v0 = vsel %vm1194_vm12, %v1178_v57, %v1210_v59 }
 0x1f5   : > { %v1242_v60 = vmul.f32 1.4142135, %v1226_v0  ;;  %1266 = vst.msk [vmem:[%s2118_s8 + $0x68] sm:$0xff] %vm774_vm4, %v1250_v61 }
 0x1f7   : > { %1258 = vst.msk [vmem:[%s2118_s8 + $0x28] sm:$0xff] %vm774_vm4, %v1242_v60 }
 0x1f8 PF: > { %s16_s25 = sadd.s32 1, %s1578_s25   ;;  %s2198_s21 = smov %s1570_s23 }
 0x1f9   : > { %p13_p8 = scmp.ge.s32.totalorder %s16_s25, 6   ;;  %s2199_s22 = smov %s1574_s24 }
 0x1fa   : > { %s2200_s23 = smov %s2203_s26  ;;  %s2201_s24 = smov %s2207_s27 }
 0x1fb   :  { %15 = sbr.rel (!%p13_p8) target bundleno = 3 (0x3), region = 83 }

</bundles_post_ra>
